<compile_context>
chip_gen: v7x
topology: tpu7x:2x2x1
jax: 0.10.0
libtpu: 0.0.40
codegen_flags: <defaults>
</compile_context>

<pallas_src>
import functools

import jax
import jax.numpy as jnp
from jax import lax
from jax.experimental import pallas as pl
from jax.experimental.pallas import tpu as pltpu

LN_EPS = 1e-5


def _round_up(x, m):
    return (x + m - 1) // m * m


def _ceil_div(a, b):
    return -(-a // b)


def _layer_norm(x, gamma, beta, d_true):
    """LayerNorm over the last axis using the true (unpadded) feature count.

    `x`, `gamma`, `beta` are f32.  Padded lanes of `x` are zero and padded
    gamma/beta are zero, so padded lanes of the result are exactly zero."""
    inv_d = 1.0 / d_true
    s = jnp.sum(x, axis=-1, keepdims=True)
    ss = jnp.sum(x * x, axis=-1, keepdims=True)
    mu = s * inv_d
    var = jnp.maximum(ss * inv_d - mu * mu, 0.0)   # guard cancellation
    return (x - mu) * lax.rsqrt(var + LN_EPS) * gamma + beta


def _critic_kernel(fc1_dims, fc2_dims,
                   state_ref, action_ref,
                   w1_ref, b1_ref, g1_ref, be1_ref,
                   w2_ref, b2_ref, g2_ref, be2_ref,
                   wa_ref, ba_ref,
                   wq_ref,
                   out_ref):
    # fc1 (bf16 MXU, f32 acc) + LayerNorm + ReLU (f32)
    h = jnp.dot(state_ref[...], w1_ref[...],
                preferred_element_type=jnp.float32) + b1_ref[...]
    h = _layer_norm(h, g1_ref[...], be1_ref[...], float(fc1_dims))
    h = jnp.maximum(h, 0.0)

    # fc2 (bf16 MXU, f32 acc) + LayerNorm
    sv = jnp.dot(h.astype(jnp.bfloat16), w2_ref[...],
                 preferred_element_type=jnp.float32) + b2_ref[...]
    sv = _layer_norm(sv, g2_ref[...], be2_ref[...], float(fc2_dims))

    # action branch (bf16 MXU, f32 acc)
    av = jnp.dot(action_ref[...], wa_ref[...],
                 preferred_element_type=jnp.float32) + ba_ref[...]

    # combine + final q head (N=1 -> VPU multiply + lane reduce, not MXU).
    # q bias is added in the wrapper.
    z = jnp.maximum(sv + av, 0.0)
    out_ref[...] = jnp.sum(z * wq_ref[...], axis=-1, keepdims=True)


def _pad2(a, rows, cols, dtype=jnp.float32):
    a = a.astype(dtype)
    return jnp.pad(a, ((0, rows - a.shape[0]), (0, cols - a.shape[1])))


def critic_forward(state, action, params, *, tb=1024):
    """state: (B, input_dims) f32, action: (B, n_actions) f32 -> (B, 1) f32."""
    B, in_dims = state.shape
    n_actions = action.shape[1]
    fc1_dims = params["w1"].shape[1]
    fc2_dims = params["w2"].shape[1]

    # Lane-dense feature padding.
    IN_P = _round_up(in_dims, 128)
    NA_P = _round_up(n_actions, 128)
    F1_P = _round_up(fc1_dims, 128)
    F2_P = _round_up(fc2_dims, 128)

    # B-adaptive batch tiling (sublane-dense).  Force >=2 grid steps for big
    # batches so both v7x TensorCores get sharded work via "parallel".
    B8 = _round_up(B, 8)
    n_tiles = max(_ceil_div(B8, tb), 1)
    if n_tiles == 1 and B8 >= 1024:
        n_tiles = 2
    TB = _round_up(_ceil_div(B8, n_tiles), 8)
    B_P = n_tiles * TB

    # bf16 MXU operands; biases / LN params stay f32.
    state_p = _pad2(state, B_P, IN_P, jnp.bfloat16)
    action_p = _pad2(action, B_P, NA_P, jnp.bfloat16)

    w1 = _pad2(params["w1"], IN_P, F1_P, jnp.bfloat16)
    b1 = _pad2(params["b1"], 1, F1_P)
    g1 = _pad2(params["g1"], 1, F1_P)
    be1 = _pad2(params["be1"], 1, F1_P)
    w2 = _pad2(params["w2"], F1_P, F2_P, jnp.bfloat16)
    b2 = _pad2(params["b2"], 1, F2_P)
    g2 = _pad2(params["g2"], 1, F2_P)
    be2 = _pad2(params["be2"], 1, F2_P)
    wa = _pad2(params["wa"], NA_P, F2_P, jnp.bfloat16)
    ba = _pad2(params["ba"], 1, F2_P)
    wq_row = _pad2(params["wq"].T, 1, F2_P)   # (1, F2_P) f32 row for VPU reduce

    inputs = (state_p, action_p,
              w1, b1, g1, be1,
              w2, b2, g2, be2,
              wa, ba,
              wq_row)

    def resident(arr):
        # Constant index map -> Pallas keeps the block resident in VMEM.
        nd = arr.ndim
        return pl.BlockSpec(arr.shape, lambda i: (0,) * nd)

    in_specs = [
        pl.BlockSpec((TB, IN_P), lambda i: (i, 0)),   # state tile
        pl.BlockSpec((TB, NA_P), lambda i: (i, 0)),   # action tile
    ] + [resident(a) for a in inputs[2:]]

    kernel = functools.partial(_critic_kernel, fc1_dims, fc2_dims)

    # Advisory cost estimate for XLA scheduling around the custom call.
    flops = 2 * B_P * (IN_P * F1_P + F1_P * F2_P + NA_P * F2_P + F2_P)
    bytes_accessed = (sum(int(a.size) * a.dtype.itemsize for a in inputs)
                      + B_P * 4)
    cost = pl.CostEstimate(flops=flops,
                           transcendentals=2 * B_P,
                           bytes_accessed=bytes_accessed)

    out = pl.pallas_call(
        kernel,
        out_shape=jax.ShapeDtypeStruct((B_P, 1), jnp.float32),
        grid_spec=pltpu.PrefetchScalarGridSpec(
            num_scalar_prefetch=0,
            grid=(n_tiles,),
            in_specs=in_specs,
            out_specs=pl.BlockSpec((TB, 1), lambda i: (i, 0)),
        ),
        compiler_params=pltpu.CompilerParams(
            dimension_semantics=("parallel",),
            vmem_limit_bytes=32 * 1024 * 1024),
        cost_estimate=cost,
    )(*inputs)

    # Scalar q bias added here instead of shipping a (1,1) VMEM block.
    return out[:B] + params["bq"]


def init_params(key, input_dims, fc1_dims, fc2_dims, n_actions):
    """Deterministic init mirroring the PyTorch module's uniform ranges.
    Linear weights are stored as (in, out) (i.e. PyTorch weight transposed)."""
    ks = jax.random.split(key, 8)
    f1 = 1.0 / jnp.sqrt(jnp.float32(fc1_dims))   # 1/sqrt(fc1.weight.size(0))
    f2 = 1.0 / jnp.sqrt(jnp.float32(fc2_dims))
    f3 = 0.003
    f4 = 1.0 / jnp.sqrt(jnp.float32(fc2_dims))   # action_value.weight.size(0)

    def u(k, shape, bound):
        return jax.random.uniform(k, shape, jnp.float32, -bound, bound)

    return {
        "w1": u(ks[0], (input_dims, fc1_dims), f1),
        "b1": u(ks[1], (1, fc1_dims), f1),
        "g1": jnp.ones((1, fc1_dims), jnp.float32),    # LayerNorm weight
        "be1": jnp.zeros((1, fc1_dims), jnp.float32),  # LayerNorm bias
        "w2": u(ks[2], (fc1_dims, fc2_dims), f2),
        "b2": u(ks[3], (1, fc2_dims), f2),
        "g2": jnp.ones((1, fc2_dims), jnp.float32),
        "be2": jnp.zeros((1, fc2_dims), jnp.float32),
        "wa": u(ks[4], (n_actions, fc2_dims), f4),
        "ba": u(ks[5], (1, fc2_dims), f4),
        "wq": u(ks[6], (fc2_dims, 1), f3),
        "bq": u(ks[7], (1, 1), f3),
    }


def critic_forward_ref(state, action, p):
    """Pure-JAX f32 reference (PyTorch semantics) for correctness checking."""
    def ln(x, gamma, beta):
        mu = jnp.mean(x, axis=-1, keepdims=True)
        var = jnp.mean((x - mu) * (x - mu), axis=-1, keepdims=True)
        return (x - mu) * lax.rsqrt(var + LN_EPS) * gamma + beta

    h = state @ p["w1"] + p["b1"]
    h = jnp.maximum(ln(h, p["g1"], p["be1"]), 0.0)
    sv = ln(h @ p["w2"] + p["b2"], p["g2"], p["be2"])
    av = action @ p["wa"] + p["ba"]
    z = jnp.maximum(sv + av, 0.0)
    return z @ p["wq"] + p["bq"]


if __name__ == "__main__":
    batch = 2
    input_dims = 16
    fc1_dims = 32
    fc2_dims = 32
    n_actions = 4

    key = jax.random.PRNGKey(0)
    k_state, k_action, k_params = jax.random.split(key, 3)

    state = jax.random.normal(k_state, (batch, input_dims), jnp.float32)
    action = jax.random.normal(k_action, (batch, n_actions), jnp.float32)
    params = init_params(k_params, input_dims, fc1_dims, fc2_dims, n_actions)

    out = critic_forward(state, action, params)
    out = jax.block_until_ready(out)

    ref = critic_forward_ref(state, action, params)
    assert out.shape == (batch, 1), out.shape
    # bf16 MXU operands -> looser tolerance than a pure-f32 kernel.
    assert jnp.allclose(out, ref, atol=1e-2, rtol=1e-2), (out, ref)

    print("KERNEL_OK")
</pallas_src>

<mosaic_0001>
module attributes {stable_mosaic.version = 11 : i64} {
  func.func @_critic_kernel(%arg0: i32, %arg1: memref<8x128xbf16, #tpu.memory_space<vmem>>, %arg2: memref<8x128xbf16, #tpu.memory_space<vmem>>, %arg3: memref<128x128xbf16, #tpu.memory_space<vmem>>, %arg4: memref<1x128xf32, #tpu.memory_space<vmem>>, %arg5: memref<1x128xf32, #tpu.memory_space<vmem>>, %arg6: memref<1x128xf32, #tpu.memory_space<vmem>>, %arg7: memref<128x128xbf16, #tpu.memory_space<vmem>>, %arg8: memref<1x128xf32, #tpu.memory_space<vmem>>, %arg9: memref<1x128xf32, #tpu.memory_space<vmem>>, %arg10: memref<1x128xf32, #tpu.memory_space<vmem>>, %arg11: memref<128x128xbf16, #tpu.memory_space<vmem>>, %arg12: memref<1x128xf32, #tpu.memory_space<vmem>>, %arg13: memref<1x128xf32, #tpu.memory_space<vmem>>, %arg14: memref<8x1xf32, #tpu.memory_space<vmem>>) attributes {dimension_semantics = [#tpu.dimension_semantics<parallel>], iteration_bounds = array<i64: 1>, scalar_prefetch = 0 : i64, scratch_operands = 0 : i64, tpu.core_type = #tpu.core_type<tc>, window_params = [{transform_indices = @transform_0, window_bounds = array<i64: 8, 128>}, {transform_indices = @transform_1, window_bounds = array<i64: 8, 128>}, {pipeline_mode = #tpu.pipeline_mode<synchronous>, transform_indices = @transform_2, window_bounds = array<i64: 128, 128>}, {pipeline_mode = #tpu.pipeline_mode<synchronous>, transform_indices = @transform_3, window_bounds = array<i64: 1, 128>}, {pipeline_mode = #tpu.pipeline_mode<synchronous>, transform_indices = @transform_4, window_bounds = array<i64: 1, 128>}, {pipeline_mode = #tpu.pipeline_mode<synchronous>, transform_indices = @transform_5, window_bounds = array<i64: 1, 128>}, {pipeline_mode = #tpu.pipeline_mode<synchronous>, transform_indices = @transform_6, window_bounds = array<i64: 128, 128>}, {pipeline_mode = #tpu.pipeline_mode<synchronous>, transform_indices = @transform_7, window_bounds = array<i64: 1, 128>}, {pipeline_mode = #tpu.pipeline_mode<synchronous>, transform_indices = @transform_8, window_bounds = array<i64: 1, 128>}, {pipeline_mode = #tpu.pipeline_mode<synchronous>, transform_indices = @transform_9, window_bounds = array<i64: 1, 128>}, {pipeline_mode = #tpu.pipeline_mode<synchronous>, transform_indices = @transform_10, window_bounds = array<i64: 128, 128>}, {pipeline_mode = #tpu.pipeline_mode<synchronous>, transform_indices = @transform_11, window_bounds = array<i64: 1, 128>}, {pipeline_mode = #tpu.pipeline_mode<synchronous>, transform_indices = @transform_12, window_bounds = array<i64: 1, 128>}, {transform_indices = @transform_13, window_bounds = array<i64: 8, 1>}]} {
    %c0 = arith.constant 0 : index
    %c0_0 = arith.constant 0 : index
    %0 = vector.load %arg1[%c0, %c0_0] : memref<8x128xbf16, #tpu.memory_space<vmem>>, vector<8x128xbf16>
    %c0_1 = arith.constant 0 : index
    %c0_2 = arith.constant 0 : index
    %1 = vector.load %arg3[%c0_1, %c0_2] : memref<128x128xbf16, #tpu.memory_space<vmem>>, vector<128x128xbf16>
    %cst = arith.constant dense<0.000000e+00> : vector<8x128xf32>
    %2 = tpu.matmul %0, %1, %cst {dimension_numbers = #tpu.dot_dimension_numbers<[1], [0], [0], [1], [0, 0, 1, 1], [], []>} : vector<8x128xbf16>, vector<128x128xbf16>, vector<8x128xf32> -> vector<8x128xf32>
    %c0_3 = arith.constant 0 : index
    %c0_4 = arith.constant 0 : index
    %3 = vector.load %arg4[%c0_3, %c0_4] : memref<1x128xf32, #tpu.memory_space<vmem>>, vector<1x128xf32>
    %4 = vector.broadcast %3 : vector<1x128xf32> to vector<8x128xf32>
    %5 = arith.addf %2, %4 : vector<8x128xf32>
    %c0_5 = arith.constant 0 : index
    %c0_6 = arith.constant 0 : index
    %6 = vector.load %arg5[%c0_5, %c0_6] : memref<1x128xf32, #tpu.memory_space<vmem>>, vector<1x128xf32>
    %c0_7 = arith.constant 0 : index
    %c0_8 = arith.constant 0 : index
    %7 = vector.load %arg6[%c0_7, %c0_8] : memref<1x128xf32, #tpu.memory_space<vmem>>, vector<1x128xf32>
    %cst_9 = arith.constant dense<0.000000e+00> : vector<8xf32>
    %8 = vector.multi_reduction <add>, %5, %cst_9 [1] : vector<8x128xf32> to vector<8xf32>
    %9 = vector.shape_cast %8 : vector<8xf32> to vector<8x1xf32>
    %10 = arith.mulf %5, %5 : vector<8x128xf32>
    %cst_10 = arith.constant dense<0.000000e+00> : vector<8xf32>
    %11 = vector.multi_reduction <add>, %10, %cst_10 [1] : vector<8x128xf32> to vector<8xf32>
    %12 = vector.shape_cast %11 : vector<8xf32> to vector<8x1xf32>
    %cst_11 = arith.constant 3.125000e-02 : f32
    %13 = vector.broadcast %cst_11 : f32 to vector<8x1xf32>
    %14 = arith.mulf %9, %13 : vector<8x1xf32>
    %cst_12 = arith.constant 3.125000e-02 : f32
    %15 = vector.broadcast %cst_12 : f32 to vector<8x1xf32>
    %16 = arith.mulf %12, %15 : vector<8x1xf32>
    %17 = arith.mulf %14, %14 : vector<8x1xf32>
    %18 = arith.subf %16, %17 : vector<8x1xf32>
    %cst_13 = arith.constant 0.000000e+00 : f32
    %19 = vector.broadcast %cst_13 : f32 to vector<8x1xf32>
    %20 = arith.maximumf %18, %19 : vector<8x1xf32>
    %21 = vector.broadcast %14 : vector<8x1xf32> to vector<8x128xf32>
    %22 = arith.subf %5, %21 : vector<8x128xf32>
    %cst_14 = arith.constant 9.99999974E-6 : f32
    %23 = vector.broadcast %cst_14 : f32 to vector<8x1xf32>
    %24 = arith.addf %20, %23 : vector<8x1xf32>
    %25 = math.rsqrt %24 : vector<8x1xf32>
    %26 = vector.broadcast %25 : vector<8x1xf32> to vector<8x128xf32>
    %27 = arith.mulf %22, %26 : vector<8x128xf32>
    %28 = vector.broadcast %6 : vector<1x128xf32> to vector<8x128xf32>
    %29 = arith.mulf %27, %28 : vector<8x128xf32>
    %30 = vector.broadcast %7 : vector<1x128xf32> to vector<8x128xf32>
    %31 = arith.addf %29, %30 : vector<8x128xf32>
    %cst_15 = arith.constant 0.000000e+00 : f32
    %32 = vector.broadcast %cst_15 : f32 to vector<8x128xf32>
    %33 = arith.maximumf %31, %32 : vector<8x128xf32>
    %34 = arith.truncf %33 : vector<8x128xf32> to vector<8x128xbf16>
    %c0_16 = arith.constant 0 : index
    %c0_17 = arith.constant 0 : index
    %35 = vector.load %arg7[%c0_16, %c0_17] : memref<128x128xbf16, #tpu.memory_space<vmem>>, vector<128x128xbf16>
    %cst_18 = arith.constant dense<0.000000e+00> : vector<8x128xf32>
    %36 = tpu.matmul %34, %35, %cst_18 {dimension_numbers = #tpu.dot_dimension_numbers<[1], [0], [0], [1], [0, 0, 1, 1], [], []>} : vector<8x128xbf16>, vector<128x128xbf16>, vector<8x128xf32> -> vector<8x128xf32>
    %c0_19 = arith.constant 0 : index
    %c0_20 = arith.constant 0 : index
    %37 = vector.load %arg8[%c0_19, %c0_20] : memref<1x128xf32, #tpu.memory_space<vmem>>, vector<1x128xf32>
    %38 = vector.broadcast %37 : vector<1x128xf32> to vector<8x128xf32>
    %39 = arith.addf %36, %38 : vector<8x128xf32>
    %c0_21 = arith.constant 0 : index
    %c0_22 = arith.constant 0 : index
    %40 = vector.load %arg9[%c0_21, %c0_22] : memref<1x128xf32, #tpu.memory_space<vmem>>, vector<1x128xf32>
    %c0_23 = arith.constant 0 : index
    %c0_24 = arith.constant 0 : index
    %41 = vector.load %arg10[%c0_23, %c0_24] : memref<1x128xf32, #tpu.memory_space<vmem>>, vector<1x128xf32>
    %cst_25 = arith.constant dense<0.000000e+00> : vector<8xf32>
    %42 = vector.multi_reduction <add>, %39, %cst_25 [1] : vector<8x128xf32> to vector<8xf32>
    %43 = vector.shape_cast %42 : vector<8xf32> to vector<8x1xf32>
    %44 = arith.mulf %39, %39 : vector<8x128xf32>
    %cst_26 = arith.constant dense<0.000000e+00> : vector<8xf32>
    %45 = vector.multi_reduction <add>, %44, %cst_26 [1] : vector<8x128xf32> to vector<8xf32>
    %46 = vector.shape_cast %45 : vector<8xf32> to vector<8x1xf32>
    %cst_27 = arith.constant 3.125000e-02 : f32
    %47 = vector.broadcast %cst_27 : f32 to vector<8x1xf32>
    %48 = arith.mulf %43, %47 : vector<8x1xf32>
    %cst_28 = arith.constant 3.125000e-02 : f32
    %49 = vector.broadcast %cst_28 : f32 to vector<8x1xf32>
    %50 = arith.mulf %46, %49 : vector<8x1xf32>
    %51 = arith.mulf %48, %48 : vector<8x1xf32>
    %52 = arith.subf %50, %51 : vector<8x1xf32>
    %cst_29 = arith.constant 0.000000e+00 : f32
    %53 = vector.broadcast %cst_29 : f32 to vector<8x1xf32>
    %54 = arith.maximumf %52, %53 : vector<8x1xf32>
    %55 = vector.broadcast %48 : vector<8x1xf32> to vector<8x128xf32>
    %56 = arith.subf %39, %55 : vector<8x128xf32>
    %cst_30 = arith.constant 9.99999974E-6 : f32
    %57 = vector.broadcast %cst_30 : f32 to vector<8x1xf32>
    %58 = arith.addf %54, %57 : vector<8x1xf32>
    %59 = math.rsqrt %58 : vector<8x1xf32>
    %60 = vector.broadcast %59 : vector<8x1xf32> to vector<8x128xf32>
    %61 = arith.mulf %56, %60 : vector<8x128xf32>
    %62 = vector.broadcast %40 : vector<1x128xf32> to vector<8x128xf32>
    %63 = arith.mulf %61, %62 : vector<8x128xf32>
    %64 = vector.broadcast %41 : vector<1x128xf32> to vector<8x128xf32>
    %65 = arith.addf %63, %64 : vector<8x128xf32>
    %c0_31 = arith.constant 0 : index
    %c0_32 = arith.constant 0 : index
    %66 = vector.load %arg2[%c0_31, %c0_32] : memref<8x128xbf16, #tpu.memory_space<vmem>>, vector<8x128xbf16>
    %c0_33 = arith.constant 0 : index
    %c0_34 = arith.constant 0 : index
    %67 = vector.load %arg11[%c0_33, %c0_34] : memref<128x128xbf16, #tpu.memory_space<vmem>>, vector<128x128xbf16>
    %cst_35 = arith.constant dense<0.000000e+00> : vector<8x128xf32>
    %68 = tpu.matmul %66, %67, %cst_35 {dimension_numbers = #tpu.dot_dimension_numbers<[1], [0], [0], [1], [0, 0, 1, 1], [], []>} : vector<8x128xbf16>, vector<128x128xbf16>, vector<8x128xf32> -> vector<8x128xf32>
    %c0_36 = arith.constant 0 : index
    %c0_37 = arith.constant 0 : index
    %69 = vector.load %arg12[%c0_36, %c0_37] : memref<1x128xf32, #tpu.memory_space<vmem>>, vector<1x128xf32>
    %70 = vector.broadcast %69 : vector<1x128xf32> to vector<8x128xf32>
    %71 = arith.addf %68, %70 : vector<8x128xf32>
    %72 = arith.addf %65, %71 : vector<8x128xf32>
    %cst_38 = arith.constant 0.000000e+00 : f32
    %73 = vector.broadcast %cst_38 : f32 to vector<8x128xf32>
    %74 = arith.maximumf %72, %73 : vector<8x128xf32>
    %c0_39 = arith.constant 0 : index
    %c0_40 = arith.constant 0 : index
    %75 = vector.load %arg13[%c0_39, %c0_40] : memref<1x128xf32, #tpu.memory_space<vmem>>, vector<1x128xf32>
    %76 = vector.broadcast %75 : vector<1x128xf32> to vector<8x128xf32>
    %77 = arith.mulf %74, %76 : vector<8x128xf32>
    %cst_41 = arith.constant dense<0.000000e+00> : vector<8xf32>
    %78 = vector.multi_reduction <add>, %77, %cst_41 [1] : vector<8x128xf32> to vector<8xf32>
    %79 = vector.shape_cast %78 : vector<8xf32> to vector<8x1xf32>
    %c0_42 = arith.constant 0 : index
    %c0_43 = arith.constant 0 : index
    %80 = vector.load %arg14[%c0_42, %c0_43] : memref<8x1xf32, #tpu.memory_space<vmem>>, vector<8x1xf32>
    tpu.vector_store %arg14[%c0_42, %c0_43], %79 {strides = array<i32>} : memref<8x1xf32, #tpu.memory_space<vmem>>, vector<8x1xf32>,
    return
  }
  func.func @transform_0(%arg0: i32) -> (i32, i32) {
    %c0_i32 = arith.constant 0 : i32
    %c0_i32_0 = arith.constant 0 : i32
    return %arg0, %c0_i32 : i32, i32
  }
  func.func @transform_1(%arg0: i32) -> (i32, i32) {
    %c0_i32 = arith.constant 0 : i32
    %c0_i32_0 = arith.constant 0 : i32
    return %arg0, %c0_i32 : i32, i32
  }
  func.func @transform_2(%arg0: i32) -> (i32, i32) {
    %c0_i32 = arith.constant 0 : i32
    %c0_i32_0 = arith.constant 0 : i32
    %c0_i32_1 = arith.constant 0 : i32
    return %c0_i32, %c0_i32_0 : i32, i32
  }
  func.func @transform_3(%arg0: i32) -> (i32, i32) {
    %c0_i32 = arith.constant 0 : i32
    %c0_i32_0 = arith.constant 0 : i32
    %c0_i32_1 = arith.constant 0 : i32
    return %c0_i32, %c0_i32_0 : i32, i32
  }
  func.func @transform_4(%arg0: i32) -> (i32, i32) {
    %c0_i32 = arith.constant 0 : i32
    %c0_i32_0 = arith.constant 0 : i32
    %c0_i32_1 = arith.constant 0 : i32
    return %c0_i32, %c0_i32_0 : i32, i32
  }
  func.func @transform_5(%arg0: i32) -> (i32, i32) {
    %c0_i32 = arith.constant 0 : i32
    %c0_i32_0 = arith.constant 0 : i32
    %c0_i32_1 = arith.constant 0 : i32
    return %c0_i32, %c0_i32_0 : i32, i32
  }
  func.func @transform_6(%arg0: i32) -> (i32, i32) {
    %c0_i32 = arith.constant 0 : i32
    %c0_i32_0 = arith.constant 0 : i32
    %c0_i32_1 = arith.constant 0 : i32
    return %c0_i32, %c0_i32_0 : i32, i32
  }
  func.func @transform_7(%arg0: i32) -> (i32, i32) {
    %c0_i32 = arith.constant 0 : i32
    %c0_i32_0 = arith.constant 0 : i32
    %c0_i32_1 = arith.constant 0 : i32
    return %c0_i32, %c0_i32_0 : i32, i32
  }
  func.func @transform_8(%arg0: i32) -> (i32, i32) {
    %c0_i32 = arith.constant 0 : i32
    %c0_i32_0 = arith.constant 0 : i32
    %c0_i32_1 = arith.constant 0 : i32
    return %c0_i32, %c0_i32_0 : i32, i32
  }
  func.func @transform_9(%arg0: i32) -> (i32, i32) {
    %c0_i32 = arith.constant 0 : i32
    %c0_i32_0 = arith.constant 0 : i32
    %c0_i32_1 = arith.constant 0 : i32
    return %c0_i32, %c0_i32_0 : i32, i32
  }
  func.func @transform_10(%arg0: i32) -> (i32, i32) {
    %c0_i32 = arith.constant 0 : i32
    %c0_i32_0 = arith.constant 0 : i32
    %c0_i32_1 = arith.constant 0 : i32
    return %c0_i32, %c0_i32_0 : i32, i32
  }
  func.func @transform_11(%arg0: i32) -> (i32, i32) {
    %c0_i32 = arith.constant 0 : i32
    %c0_i32_0 = arith.constant 0 : i32
    %c0_i32_1 = arith.constant 0 : i32
    return %c0_i32, %c0_i32_0 : i32, i32
  }
  func.func @transform_12(%arg0: i32) -> (i32, i32) {
    %c0_i32 = arith.constant 0 : i32
    %c0_i32_0 = arith.constant 0 : i32
    %c0_i32_1 = arith.constant 0 : i32
    return %c0_i32, %c0_i32_0 : i32, i32
  }
  func.func @transform_13(%arg0: i32) -> (i32, i32) {
    %c0_i32 = arith.constant 0 : i32
    %c0_i32_0 = arith.constant 0 : i32
    return %arg0, %c0_i32 : i32, i32
  }
}

</mosaic_0001>

<bundles_post_ra>
// kernel: tpu_custom_call.1
= control target key start
LH: loop header
LB: loop body
LE: loop exit
PB: predicated region body
PF: predicated region fallthrough
CT: control target
= control target key end

     0   :  { %18 = vsyncpa [#allocation3], 0  ;;  %s1010_s0 = inlined_call_operand.hbm [shape: bf16[8,128], index: 0, kind: input, shape index: {}]   ;;  %s1011_s1 = inlined_call_operand.hbm [shape: bf16[8,128], index: 1, kind: input, shape index: {}]   ;;  %s1012_s2 = inlined_call_operand.hbm [shape: bf16[128,128], index: 2, kind: input, shape index: {}]   ;;  %s1013_s3 = inlined_call_operand.vmem [shape: f32[1,128], index: 3, kind: input, shape index: {}]   ;;  %s1014_s4 = inlined_call_operand.vmem [shape: f32[1,128], index: 4, kind: input, shape index: {}]   ;;  %s1015_s5 = inlined_call_operand.vmem [shape: f32[1,128], index: 5, kind: input, shape index: {}]   ;;  %s1016_s6 = inlined_call_operand.hbm [shape: bf16[128,128], index: 6, kind: input, shape index: {}]   ;;  %s1017_s7 = inlined_call_operand.vmem [shape: f32[1,128], index: 7, kind: input, shape index: {}]   ;;  %s1018_s8 = inlined_call_operand.vmem [shape: f32[1,128], index: 8, kind: input, shape index: {}]   ;;  %s1019_s9 = inlined_call_operand.vmem [shape: f32[1,128], index: 9, kind: input, shape index: {}]   ;;  %s1020_s10 = inlined_call_operand.hbm [shape: bf16[128,128], index: 10, kind: input, shape index: {}]   ;;  %s1021_s11 = inlined_call_operand.vmem [shape: f32[1,128], index: 11, kind: input, shape index: {}]   ;;  %s1022_s12 = inlined_call_operand.vmem [shape: f32[1,128], index: 12, kind: input, shape index: {}]   ;;  %s1023_s13 = inlined_call_operand.vmem [shape: f32[8,1], index: 13, kind: output, shape index: {}]  }
   0x1   :  { %19 = vsyncpa [#allocation5], 0 }
   0x2   :  { %20 = vsyncpa [#allocation8], 0  ;;  %s799_s25 = smov [#allocation4]   ;;  %s683_s29 = scalar_lea.hbm %s1011_s1, 64 }
   0x3   :  { %s37_s26 = sshll.u32 %s799_s25, 4  ;;  %p684_p0 = scmp.ne.s32.totalorder %s1011_s1, %s683_s29  ;;  %s38_s26 = int_to_ptr.vmem [resolvable:$true] %s37_s26 }
   0x4   :  { %p687_p1 = scmp.lt.u32.totalorder %s683_s29, %s1011_s1 }
   0x6   :  { %p689_p2 = pnand %p687_p1, %p684_p0 }
   0x8   :  { %692 = shalt.err (!%p689_p2)
}
   0x9   :  { %s693_s17 = scalar_lea.vmem %s38_s26, 64  ;;  %p698_p4 = scmp.lt.s32.totalorder %s38_s26, %s38_s26 }
   0xa   :  { %p694_p3 = scmp.ne.s32.totalorder %s38_s26, %s693_s17  ;;  %p699_p5 = scmp.lt.s32.totalorder %s693_s17, %s693_s17 }
   0xc   :  { %p700_p6 = por %p699_p5, %p698_p4 }
   0xe   :  { %p701_p7 = pnand %p700_p6, %p694_p3 }
  0x10   :  { %704 = shalt.err (!%p701_p7)
}
  0x11   :  { %40 = dma.hbm_to_vmem [thread:$0]  %s1011_s1, 64, %s38_s26, [#allocation5]  }
  0x12   :  { %s800_s20 = smov [#allocation7]   ;;  %s801_s22 = smov [#allocation2]  }
  0x13   :  { %s64_s21 = sshll.u32 %s800_s20, 4  ;;  %s27_s23 = sshll.u32 %s801_s22, 4  ;;  %s65_s21 = int_to_ptr.vmem [resolvable:$true] %s64_s21  ;;  %s28_s23 = int_to_ptr.vmem [resolvable:$true] %s27_s23 }
  0x14   :  { %s705_s27 = scalar_lea.hbm %s1016_s6, 1024 }
  0x15   :  { %p706_p8 = scmp.ne.s32.totalorder %s1016_s6, %s705_s27  ;;  %p709_p9 = scmp.lt.u32.totalorder %s705_s27, %s1016_s6 }
  0x17   :  { %p711_p10 = pnand %p709_p9, %p706_p8 }
  0x19   :  { %714 = shalt.err (!%p711_p10)
}
  0x1a   :  { %s715_s1 = scalar_lea.vmem %s65_s21, 1024  ;;  %p720_p12 = scmp.lt.s32.totalorder %s65_s21, %s65_s21 }
  0x1b   :  { %p716_p11 = scmp.ne.s32.totalorder %s65_s21, %s715_s1  ;;  %p721_p13 = scmp.lt.s32.totalorder %s715_s1, %s715_s1 }
  0x1d   :  { %p722_p0 = por %p721_p13, %p720_p12 }
  0x1f   :  { %p723_p1 = pnand %p722_p0, %p716_p11 }
  0x21   :  { %726 = shalt.err (!%p723_p1)
}
  0x22   :  { %s802_s26 = smov 64   ;;  %s803_s15 = smov 4  }
  0x23   :  { %70 = dma.hbm_to_vmem [thread:$0]  %s1016_s6, 1024, %s65_s21, [#allocation8], %s802_s26, %s802_s26, %s803_s15  }
  0x24   :  { %s727_s20 = scalar_lea.hbm %s1010_s0, 64 }
  0x25   :  { %p728_p2 = scmp.ne.s32.totalorder %s1010_s0, %s727_s20  ;;  %p731_p3 = scmp.lt.u32.totalorder %s727_s20, %s1010_s0 }
  0x27   :  { %p733_p4 = pnand %p731_p3, %p728_p2 }
  0x29   :  { %736 = shalt.err (!%p733_p4)
}
  0x2a   :  { %s737_s28 = scalar_lea.vmem %s28_s23, 64  ;;  %p742_p6 = scmp.lt.s32.totalorder %s28_s23, %s28_s23 }
  0x2b   :  { %p738_p5 = scmp.ne.s32.totalorder %s28_s23, %s737_s28  ;;  %p743_p7 = scmp.lt.s32.totalorder %s737_s28, %s737_s28 }
  0x2d   :  { %p744_p8 = por %p743_p7, %p742_p6 }
  0x2f   :  { %p745_p9 = pnand %p744_p8, %p738_p5 }
  0x31   :  { %748 = shalt.err (!%p745_p9)
}
  0x32   :  { %30 = dma.hbm_to_vmem [thread:$0]  %s1010_s0, 64, %s28_s23, [#allocation3]  }
  0x33   :  { %s804_s29 = smov [#allocation6]   ;;  %s805_s14 = smov [#allocation9]  }
  0x34   :  { %s46_s30 = sshll.u32 %s804_s29, 4  ;;  %s82_s1 = sshll.u32 %s805_s14, 4  ;;  %s47_s30 = int_to_ptr.vmem [resolvable:$true] %s46_s30  ;;  %s83_s1 = int_to_ptr.vmem [resolvable:$true] %s82_s1 }
  0x35   :  { %s749_s18 = scalar_lea.hbm %s1012_s2, 1024 }
  0x36   :  { %p750_p10 = scmp.ne.s32.totalorder %s1012_s2, %s749_s18  ;;  %p753_p11 = scmp.lt.u32.totalorder %s749_s18, %s1012_s2 }
  0x38   :  { %p755_p12 = pnand %p753_p11, %p750_p10 }
  0x3a   :  { %758 = shalt.err (!%p755_p12)
}
  0x3b   :  { %s759_s0 = scalar_lea.vmem %s47_s30, 1024  ;;  %p764_p0 = scmp.lt.s32.totalorder %s47_s30, %s47_s30 }
  0x3c   :  { %p760_p13 = scmp.ne.s32.totalorder %s47_s30, %s759_s0  ;;  %p765_p1 = scmp.lt.s32.totalorder %s759_s0, %s759_s0 }
  0x3e   :  { %p766_p2 = por %p765_p1, %p764_p0 }
  0x40   :  { %p767_p3 = pnand %p766_p2, %p760_p13 }
  0x42   :  { %770 = shalt.err (!%p767_p3)
}
  0x43   :  { %52 = dma.hbm_to_vmem [thread:$0]  %s1012_s2, 1024, %s47_s30, [#allocation5], %s802_s26, %s802_s26, %s803_s15  }
  0x44   :  { %s771_s6 = scalar_lea.hbm %s1020_s10, 1024 }
  0x45   :  { %p772_p4 = scmp.ne.s32.totalorder %s1020_s10, %s771_s6  ;;  %p775_p5 = scmp.lt.u32.totalorder %s771_s6, %s1020_s10 }
  0x47   :  { %p777_p6 = pnand %p775_p5, %p772_p4 }
  0x49   :  { %780 = shalt.err (!%p777_p6)
}
  0x4a   :  { %s781_s17 = scalar_lea.vmem %s83_s1, 1024  ;;  %p786_p8 = scmp.lt.s32.totalorder %s83_s1, %s83_s1 }
  0x4b   :  { %p782_p7 = scmp.ne.s32.totalorder %s83_s1, %s781_s17  ;;  %p787_p9 = scmp.lt.s32.totalorder %s781_s17, %s781_s17 }
  0x4d   :  { %p788_p10 = por %p787_p9, %p786_p8 }
  0x4f   :  { %p789_p11 = pnand %p788_p10, %p782_p7 }
  0x51   :  { %792 = shalt.err (!%p789_p11)
}
  0x52   :  { %88 = dma.hbm_to_vmem [thread:$0]  %s1020_s10, 1024, %s83_s1, [#allocation8], %s802_s26, %s802_s26, %s803_s15  }
  0x53   :  { %793 = dma.done.wait [#allocation3], 64  }
  0x54   :  { %794 = vsyncadd [#allocation3], 4294967232 }
  0x55   :  { %795 = dma.done.wait [#allocation5], 1088  }
  0x56   :  { %796 = vsyncadd [#allocation5], 4294966208 }
  0x57   :  { %797 = dma.done.wait [#allocation8], 2048  }
  0x58   :  { %798 = vsyncadd [#allocation8], 4294965248  ;;  %v806_v0 = vmov 0.0   ;;  %vm807_vm0 = vmmov 0   ;;  %v655_v1 = vld [vmem:[#allocation6] sm:$0xff]   ;;  %v656_v2 = vld [vmem:[#allocation6 + $0x8] sm:$0xff]  }
  0x59   :  { %586 = vmatprep.subr.bf16.mxu0 %v806_v0  ;;  %602 = vmatprep.mubr.msk.bf16.mxu0 %vm807_vm0, %v806_v0  ;;  %v657_v3 = vld [vmem:[#allocation6 + $0x10] sm:$0xff]   ;;  %v658_v4 = vld [vmem:[#allocation6 + $0x18] sm:$0xff]   ;;  %v659_v5 = vld [vmem:[#allocation6 + $0x20] sm:$0xff]   ;;  %vm518_vm1 = vcmask 7168  }
  0x5a   :  { %606 = vmatprep.subr.bf16.mxu1 %v806_v0  ;;  %622 = vmatprep.mubr.msk.bf16.mxu1 %vm807_vm0, %v806_v0  ;;  %v660_v6 = vld [vmem:[#allocation6 + $0x28] sm:$0xff]   ;;  %v661_v7 = vld [vmem:[#allocation6 + $0x30] sm:$0xff]   ;;  %v662_v8 = vld [vmem:[#allocation6 + $0x38] sm:$0xff]  }
  0x5b   :  { %587 = vmatpush3.bf16.msra.mxu0 %v655_v1  ;;  %v109_v9 = vld [vmem:[#allocation2] sm:$0xf]  ;;  %v663_v17 = vld [vmem:[#allocation7] sm:$0xff]   ;;  %v664_v18 = vld [vmem:[#allocation7 + $0x8] sm:$0xff]  }
  0x5c   :  { %588 = vmatprep.subr.bf16.mxu0 %v806_v0  ;;  %v527_v10 = vld [vmem:[%s1013_s3] ss:$0 sm:$0xff]  ;;  %607 = vmatpush3.bf16.msra.mxu1 %v663_v17  ;;  %v665_v19 = vld [vmem:[#allocation7 + $0x10] sm:$0xff]   ;;  %v667_v21 = vld [vmem:[#allocation7 + $0x20] sm:$0xff]  }
  0x5d   :  { %608 = vmatprep.subr.bf16.mxu1 %v806_v0  ;;  %v666_v20 = vld [vmem:[#allocation7 + $0x18] sm:$0xff]   ;;  %v668_v22 = vld [vmem:[#allocation7 + $0x28] sm:$0xff]   ;;  %v669_v23 = vld [vmem:[#allocation7 + $0x30] sm:$0xff]  }
  0x5e   :  { %v670_v24 = vld [vmem:[#allocation7 + $0x38] sm:$0xff]   ;;  %v671_v25 = vld [vmem:[#allocation9] sm:$0xff]   ;;  %v672_v26 = vld [vmem:[#allocation9 + $0x8] sm:$0xff]  }
  0x5f   :  { %589 = vmatpush3.bf16.msra.mxu0 %v656_v2  ;;  %v673_v27 = vld [vmem:[#allocation9 + $0x10] sm:$0xff]   ;;  %v674_v28 = vld [vmem:[#allocation9 + $0x18] sm:$0xff]   ;;  %v675_v29 = vld [vmem:[#allocation9 + $0x20] sm:$0xff]  }
  0x60   :  { %590 = vmatprep.subr.bf16.mxu0 %v806_v0  ;;  %609 = vmatpush3.bf16.msra.mxu1 %v664_v18  ;;  %v676_v30 = vld [vmem:[#allocation9 + $0x28] sm:$0xff]   ;;  %v677_v31 = vld [vmem:[#allocation9 + $0x30] sm:$0xff]   ;;  %v678_v32 = vld [vmem:[#allocation9 + $0x38] sm:$0xff]  }
  0x61   :  { %610 = vmatprep.subr.bf16.mxu1 %v806_v0  ;;  %v394_v33 = vld [vmem:[#allocation4] sm:$0xf]  ;;  %v536_v44 = vld [vmem:[%s1014_s4] ss:$0 sm:$0xff] }
  0x62   :  { %v537_v46 = vld [vmem:[%s1015_s5] ss:$0 sm:$0xff] }
  0x63   :  { %591 = vmatpush3.bf16.msra.mxu0 %v657_v3  ;;  %v538_v51 = vld [vmem:[%s1017_s7] ss:$0 sm:$0xff] }
  0x64   :  { %592 = vmatprep.subr.bf16.mxu0 %v806_v0  ;;  %611 = vmatpush3.bf16.msra.mxu1 %v665_v19 }
  0x65   :  { %612 = vmatprep.subr.bf16.mxu1 %v806_v0 }
  0x67   :  { %593 = vmatpush3.bf16.msra.mxu0 %v658_v4 }
  0x68   :  { %594 = vmatprep.subr.bf16.mxu0 %v806_v0  ;;  %613 = vmatpush3.bf16.msra.mxu1 %v666_v20 }
  0x69   :  { %614 = vmatprep.subr.bf16.mxu1 %v806_v0 }
  0x6b   :  { %595 = vmatpush3.bf16.msra.mxu0 %v659_v5 }
  0x6c   :  { %596 = vmatprep.subr.bf16.mxu0 %v806_v0  ;;  %615 = vmatpush3.bf16.msra.mxu1 %v667_v21 }
  0x6d   :  { %616 = vmatprep.subr.bf16.mxu1 %v806_v0 }
  0x6f   :  { %597 = vmatpush3.bf16.msra.mxu0 %v660_v6 }
  0x70   :  { %598 = vmatprep.subr.bf16.mxu0 %v806_v0  ;;  %617 = vmatpush3.bf16.msra.mxu1 %v668_v22 }
  0x71   :  { %618 = vmatprep.subr.bf16.mxu1 %v806_v0 }
  0x73   :  { %599 = vmatpush3.bf16.msra.mxu0 %v661_v7 }
  0x74   :  { %600 = vmatprep.subr.bf16.mxu0 %v806_v0  ;;  %619 = vmatpush3.bf16.msra.mxu1 %v669_v23 }
  0x75   :  { %620 = vmatprep.subr.bf16.mxu1 %v806_v0 }
  0x77   :  { %601 = vmatpush3.bf16.msra.mxu0 %v662_v8  ;;  %v547_v8 = vld [vmem:[%s1018_s8] ss:$0 sm:$0xff] }
  0x78   :  { %626 = vmatprep.subr.bf16.mxu0 %v806_v0  ;;  %621 = vmatpush3.bf16.msra.mxu1 %v670_v24 }
  0x7a   :  { %603 = vmatmul.mubr.bf16.vlgmr.msra.gmra.mrb[0].mxu0 %v109_v9  ;;  %v549_v9 = vld [vmem:[%s1021_s11] ss:$0 sm:$0xff] }
  0x7b   :  { %642 = vmatprep.mubr.msk.bf16.mxu0 %vm807_vm0, %v806_v0  ;;  %627 = vmatpush3.bf16.msra.mxu0 %v671_v25 }
  0x7c   :  { %628 = vmatprep.subr.bf16.mxu0 %v806_v0 }
  0x7f   :  { %629 = vmatpush3.bf16.msra.mxu0 %v672_v26 }
  0x80   :  { %630 = vmatprep.subr.bf16.mxu0 %v806_v0 }
  0x83   :  { %631 = vmatpush3.bf16.msra.mxu0 %v673_v27 }
  0x84   :  { %632 = vmatprep.subr.bf16.mxu0 %v806_v0 }
  0x87   :  { %633 = vmatpush3.bf16.msra.mxu0 %v674_v28 }
  0x88   :  { %634 = vmatprep.subr.bf16.mxu0 %v806_v0 }
  0x8b   :  { %635 = vmatpush3.bf16.msra.mxu0 %v675_v29 }
  0x8c   :  { %636 = vmatprep.subr.bf16.mxu0 %v806_v0 }
  0x8f   :  { %637 = vmatpush3.bf16.msra.mxu0 %v676_v30 }
  0x90   :  { %638 = vmatprep.subr.bf16.mxu0 %v806_v0 }
  0x93   :  { %639 = vmatpush3.bf16.msra.mxu0 %v677_v31 }
  0x94   :  { %640 = vmatprep.subr.bf16.mxu0 %v806_v0 }
  0x97   :  { %641 = vmatpush3.bf16.msra.mxu0 %v678_v32 }
  0x9a   :  { %643 = vmatmul.mubr.bf16.vlgmr.msra.gmra.mrb[4].mxu0 %v394_v33 }
 0x14d   :  { %v215_v11 = vpop.f32.mrb[0].mxu0 }
 0x14e   :  { %v966_v12 = vadd.f32 %v527_v10, %v215_v11  ;;  %v604_v13 = vpop.f32.mrb[1].mxu0  ;;  %v548_v11 = vld [vmem:[%s1019_s9] ss:$0 sm:$0xff] }
 0x14f   :  { %v218_v14 = vpop.f32.mrb[2].mxu0 }
 0x150   :  { %223 = vadd.xlane.f32.xlu0 %v966_v12  ;;  %v605_v15 = vpop.f32.mrb[3].mxu0  ;;  %v225_v16 = vmul.f32 %v966_v12, %v966_v12 }
 0x154   :  { %226 = vadd.xlane.f32.xlu0 %v225_v16  ;;  %v558_v16 = vld [vmem:[%s1022_s12] ss:$0 sm:$0xff] }
 0x16d   :  { %v500_v58 = vpop.f32.mrb[4].mxu0 }
 0x16e   :  { %v644_v59 = vpop.f32.mrb[5].mxu0  ;;  %v501_v13 = vadd.f32 %v549_v9, %v500_v58 }
 0x16f   :  { %v503_v60 = vpop.f32.mrb[6].mxu0 }
 0x170   :  { %v645_v61 = vpop.f32.mrb[7].mxu0 }
 0x1dd   :  { %v224_v34 = vpop.xlane.xlu0 %223 }
 0x1de   :  { %v228_v35 = vmul.f32 0.03125, %v224_v34 }
 0x1e0   :  { %v230_v37 = vmul.f32 %v228_v35, %v228_v35  ;;  %v233_v42 = vsub.f32 %v966_v12, %v228_v35 }
 0x1e1   :  { %v227_v36 = vpop.xlane.xlu0 %226 }
 0x1e2   :  { %v229_v38 = vmul.f32 0.03125, %v227_v36 }
 0x1e4   :  { %v231_v39 = vsub.f32 %v229_v38, %v230_v37 }
 0x1e6   :  { %v232_v40 = vmax.f32 %v231_v39, 0.0 }
 0x1e8   :  { %v234_v41 = vadd.f32 1e-05, %v232_v40 }
 0x1ea   :  { %679 = vrsqrt.f32 %v234_v41 }
 0x1f4   :  { %v680_v43 = vpop.eup %679 }
 0x1f5   :  { %v236_v45 = vmul.f32 %v680_v43, %v233_v42 }
 0x1f7   :  { %v243_v47 = vmul.f32 %v536_v44, %v236_v45 }
 0x1f9   :  { %v250_v48 = vadd.f32 %v537_v46, %v243_v47 }
 0x1fb   :  { %v251_v49 = vmax.f32 %v250_v48, 0.0 }
 0x1fd   :  { %v252_v50 = vpack.c.bf16 %v251_v49, %v251_v49 }
 0x1ff   :  { %623 = vmatmul.mubr.bf16.vlgmr.msra.gmra.mrb[0].mxu1 %v252_v50 }
 0x2d2   :  { %v358_v52 = vpop.f32.mrb[0].mxu1 }
 0x2d3   :  { %v359_v53 = vadd.f32 %v538_v51, %v358_v52  ;;  %v624_v54 = vpop.f32.mrb[1].mxu1 }
 0x2d4   :  { %v361_v55 = vpop.f32.mrb[2].mxu1 }
 0x2d5   :  { %366 = vadd.xlane.f32.xlu1 %v359_v53  ;;  %v625_v56 = vpop.f32.mrb[3].mxu1  ;;  %v368_v57 = vmul.f32 %v359_v53, %v359_v53 }
 0x2d9   :  { %369 = vadd.xlane.f32.xlu1 %v368_v57 }
 0x362   :  { %v367_v62 = vpop.xlane.xlu1 %366 }
 0x363   :  { %v371_v63 = vmul.f32 0.03125, %v367_v62 }
 0x365   :  { %v373_v1 = vmul.f32 %v371_v63, %v371_v63  ;;  %v376_v6 = vsub.f32 %v359_v53, %v371_v63 }
 0x366   :  { %v370_v0 = vpop.xlane.xlu1 %369 }
 0x367   :  { %v372_v2 = vmul.f32 0.03125, %v370_v0 }
 0x369   :  { %v374_v3 = vsub.f32 %v372_v2, %v373_v1 }
 0x36b   :  { %v375_v4 = vmax.f32 %v374_v3, 0.0 }
 0x36d   :  { %v377_v5 = vadd.f32 1e-05, %v375_v4 }
 0x36f   :  { %681 = vrsqrt.f32 %v377_v5 }
 0x379   :  { %v682_v7 = vpop.eup %681 }
 0x37a   :  { %v379_v10 = vmul.f32 %v682_v7, %v376_v6 }
 0x37c   :  { %v386_v12 = vmul.f32 %v547_v8, %v379_v10 }
 0x37e   :  { %v393_v14 = vadd.f32 %v548_v11, %v386_v12 }
 0x380   :  { %v506_v15 = vadd.f32 %v501_v13, %v393_v14 }
 0x382   :  { %v507_v17 = vmax.f32 %v506_v15, 0.0 }
 0x384   :  { %v515_v18 = vmul.f32 %v558_v16, %v507_v17 }
 0x386   :  { %516 = vadd.xlane.f32.xlu0 %v515_v18 }
 0x413   :  { %v517_v19 = vpop.xlane.xlu0 %516 }
 0x414   :  { %519 = vst.msk [vmem:[%s1023_s13] sm:$0xff] %vm518_vm1, %v517_v19 }
 0x415   :  { %524 = vsyncpa [#allocation3], 1 }
 0x416   :  { %525 = vsyncpa [#allocation5], 1 }
 0x417   :  { %526 = vsyncpa [#allocation8], 1 }

</bundles_post_ra>
